<compile_context>
chip_gen: v6e
topology: v6e:2x2x1
jax: 0.10.0
libtpu: 0.0.40
codegen_flags: <defaults>
</compile_context>

<pallas_src>
import functools

import jax
import jax.numpy as jnp
from jax.experimental import pallas as pl
from jax.experimental.pallas import tpu as pltpu

IN_DIM = 100
HID_DIM = 200
OUT_DIM = 784
LN_EPS = 1e-5
LEAKY_SLOPE = 0.02


def _cdiv(a, b):
    return (a + b - 1) // b


def _round_up(n, m):
    return ((n + m - 1) // m) * m


def _generator_kernel(x_ref, w1_ref, b1_ref, gamma_ref, beta_ref,
                      w2_ref, b2_ref, o_ref):
    # Cast the f32 activations to bf16 in-kernel (rides the VPU slot).
    x = x_ref[...].astype(jnp.bfloat16)

    # Linear(100->200): bf16 operands, f32 accumulate on the MXU.
    h = jnp.dot(x, w1_ref[...], preferred_element_type=jnp.float32)
    h = h + b1_ref[...]                                        # (tb, 200) f32

    # LeakyReLU(0.02)
    h = jnp.where(h >= 0, h, LEAKY_SLOPE * h)

    # LayerNorm(200): biased variance (PyTorch semantics), f32 throughout.
    mean = jnp.mean(h, axis=-1, keepdims=True)
    centered = h - mean
    var = jnp.mean(centered * centered, axis=-1, keepdims=True)
    h = centered * jax.lax.rsqrt(var + LN_EPS)
    h = h * gamma_ref[...] + beta_ref[...]

    # Linear(200->784): bf16 operands, f32 accumulate.
    y = jnp.dot(h.astype(jnp.bfloat16), w2_ref[...],
                preferred_element_type=jnp.float32)
    y = y + b2_ref[...]                                        # (tb, 784)

    # Sigmoid = 1 / (1 + exp(-y)); exp + approx reciprocal both run on the EUP.
    # Final store in bf16 — halves the (dominant) output HBM writeback.
    o_ref[...] = pl.reciprocal(1.0 + jnp.exp(-y), approx=True).astype(o_ref.dtype)


def prepare_params(params):
    """One-time prep: cast matmul weights to bf16 (kept out of the per-call jit)."""
    w1, b1, gamma, beta, w2, b2 = params
    return (w1.astype(jnp.bfloat16),
            b1.astype(jnp.float32),
            gamma.astype(jnp.float32),
            beta.astype(jnp.float32),
            w2.astype(jnp.bfloat16),
            b2.astype(jnp.float32))


@functools.partial(jax.jit, static_argnames=("block_b",))
def generator_forward(x, prepared_params, *, block_b=1024):
    """x: (B, 100) float32. Returns (B, 784) bfloat16 (math in f32/bf16-MXU)."""
    w1, b1, gamma, beta, w2, b2 = prepared_params
    B = x.shape[0]

    # Balanced batch tiles: avoid pathological padding and give the "parallel"
    # grid axis >= 2 steps once B is large enough (v7x megacore + pipelining).
    n_tiles = max(_cdiv(B, block_b), 1)
    if B >= 512 and n_tiles < 2:
        n_tiles = 2
    tb = _round_up(_cdiv(B, n_tiles), 8)
    b_pad = _round_up(B, tb)
    grid = (b_pad // tb,)

    # Pad only the batch dim when needed; zero rows stay finite through
    # LayerNorm (var=0 + eps) and are sliced off below.
    if b_pad != B:
        x = jnp.pad(x, ((0, b_pad - B), (0, 0)))

    x_spec = pl.BlockSpec((tb, IN_DIM), lambda i: (i, 0))
    out_spec = pl.BlockSpec((tb, OUT_DIM), lambda i: (i, 0))
    resident = lambda shape: pl.BlockSpec(shape, lambda i: (0, 0))

    cost = pl.CostEstimate(
        flops=2 * b_pad * (IN_DIM * HID_DIM + HID_DIM * OUT_DIM),
        transcendentals=b_pad * (1 + 2 * OUT_DIM),     # rsqrt/row + exp + recip
        bytes_accessed=(b_pad * IN_DIM * 4                       # x (f32)
                        + (IN_DIM * HID_DIM + HID_DIM * OUT_DIM) * 2   # weights bf16
                        + 3 * HID_DIM * 4 + OUT_DIM * 4                # biases/LN f32
                        + b_pad * OUT_DIM * 2),                        # output bf16
    )

    # Right-size the VMEM limit: ~2x the per-step working set plus resident
    # weights and elementwise intermediates, with a little headroom.
    step_bytes = tb * (IN_DIM * 4 + OUT_DIM * 2)          # one x + one out block
    weight_bytes = ((IN_DIM * HID_DIM + HID_DIM * OUT_DIM) * 2
                    + (3 * HID_DIM + OUT_DIM) * 4)
    scratch_bytes = 4 * tb * HID_DIM * 4                  # f32 intermediates headroom
    vmem_limit = 2 * (2 * step_bytes + weight_bytes) + scratch_bytes + (4 << 20)
    vmem_limit = int(min(max(vmem_limit, 16 << 20), 48 << 20))

    out_padded = pl.pallas_call(
        _generator_kernel,
        out_shape=jax.ShapeDtypeStruct((b_pad, OUT_DIM), jnp.bfloat16),
        grid=grid,
        in_specs=[
            x_spec,
            resident((IN_DIM, HID_DIM)),
            resident((1, HID_DIM)),
            resident((1, HID_DIM)),
            resident((1, HID_DIM)),
            resident((HID_DIM, OUT_DIM)),
            resident((1, OUT_DIM)),
        ],
        out_specs=out_spec,
        compiler_params=pltpu.CompilerParams(
            dimension_semantics=("parallel",),
            vmem_limit_bytes=vmem_limit,
        ),
        cost_estimate=cost,
    )(x, w1, b1, gamma, beta, w2, b2)

    return out_padded[:B] if b_pad != B else out_padded


def init_params(key):
    """Deterministic init mimicking PyTorch defaults (uniform +/- 1/sqrt(fan_in);
    LayerNorm weight=1, bias=0). Linear weights stored as (in, out)."""
    k1, k2, k3, k4 = jax.random.split(key, 4)
    bound1 = 1.0 / jnp.sqrt(IN_DIM)
    bound2 = 1.0 / jnp.sqrt(HID_DIM)
    w1 = jax.random.uniform(k1, (IN_DIM, HID_DIM), jnp.float32, -bound1, bound1)
    b1 = jax.random.uniform(k2, (1, HID_DIM), jnp.float32, -bound1, bound1)
    gamma = jnp.ones((1, HID_DIM), jnp.float32)
    beta = jnp.zeros((1, HID_DIM), jnp.float32)
    w2 = jax.random.uniform(k3, (HID_DIM, OUT_DIM), jnp.float32, -bound2, bound2)
    b2 = jax.random.uniform(k4, (1, OUT_DIM), jnp.float32, -bound2, bound2)
    return (w1, b1, gamma, beta, w2, b2)


def _reference_forward(x, params):
    """Pure-JAX f32 reference (PyTorch-equivalent semantics)."""
    w1, b1, gamma, beta, w2, b2 = params
    h = x @ w1 + b1
    h = jnp.where(h >= 0, h, LEAKY_SLOPE * h)
    mean = jnp.mean(h, axis=-1, keepdims=True)
    var = jnp.mean((h - mean) ** 2, axis=-1, keepdims=True)
    h = (h - mean) * jax.lax.rsqrt(var + LN_EPS)
    h = h * gamma + beta
    return jax.nn.sigmoid(h @ w2 + b2)


# TODO(synk): the PyTorch module's Adam optimiser / train() loop / loss tracking
# is host-side training logic with no Pallas equivalent; only forward() is
# implemented.

if __name__ == "__main__":
    key = jax.random.PRNGKey(0)
    k_params, k_x = jax.random.split(key)

    params = init_params(k_params)
    prepped = prepare_params(params)

    batch = 8
    x = jax.random.normal(k_x, (batch, IN_DIM), jnp.float32)

    out = jax.block_until_ready(generator_forward(x, prepped))

    # Sanity-check against the f32 reference. Tolerance accounts for bf16 matmul
    # operands, the approximate EUP reciprocal, and the bf16 output store
    # (≈3e-3 absolute on a (0,1) range) — well within 2e-2 on a (0,1) output.
    ref = jax.block_until_ready(_reference_forward(x, params))
    assert out.shape == (batch, OUT_DIM)
    assert out.dtype == jnp.bfloat16
    out_f32 = out.astype(jnp.float32)
    assert jnp.all(jnp.isfinite(out_f32)), "non-finite output"
    assert jnp.allclose(out_f32, ref, atol=2e-2, rtol=2e-2), "mismatch vs reference"

    print("KERNEL_OK")
</pallas_src>

<mosaic_0001>
module attributes {stable_mosaic.version = 11 : i64} {
  func.func @_generator_kernel(%arg0: i32, %arg1: memref<8x100xf32, #tpu.memory_space<vmem>>, %arg2: memref<100x200xbf16, #tpu.memory_space<vmem>>, %arg3: memref<1x200xf32, #tpu.memory_space<vmem>>, %arg4: memref<1x200xf32, #tpu.memory_space<vmem>>, %arg5: memref<1x200xf32, #tpu.memory_space<vmem>>, %arg6: memref<200x784xbf16, #tpu.memory_space<vmem>>, %arg7: memref<1x784xf32, #tpu.memory_space<vmem>>, %arg8: memref<8x784xbf16, #tpu.memory_space<vmem>>) attributes {dimension_semantics = [#tpu.dimension_semantics<parallel>], iteration_bounds = array<i64: 1>, scalar_prefetch = 0 : i64, scratch_operands = 0 : i64, tpu.core_type = #tpu.core_type<tc>, window_params = [{transform_indices = @transform_0, window_bounds = array<i64: 8, 100>}, {pipeline_mode = #tpu.pipeline_mode<synchronous>, transform_indices = @transform_1, window_bounds = array<i64: 100, 200>}, {pipeline_mode = #tpu.pipeline_mode<synchronous>, transform_indices = @transform_2, window_bounds = array<i64: 1, 200>}, {pipeline_mode = #tpu.pipeline_mode<synchronous>, transform_indices = @transform_3, window_bounds = array<i64: 1, 200>}, {pipeline_mode = #tpu.pipeline_mode<synchronous>, transform_indices = @transform_4, window_bounds = array<i64: 1, 200>}, {pipeline_mode = #tpu.pipeline_mode<synchronous>, transform_indices = @transform_5, window_bounds = array<i64: 200, 784>}, {pipeline_mode = #tpu.pipeline_mode<synchronous>, transform_indices = @transform_6, window_bounds = array<i64: 1, 784>}, {transform_indices = @transform_7, window_bounds = array<i64: 8, 784>}]} {
    %c0 = arith.constant 0 : index
    %c0_0 = arith.constant 0 : index
    %0 = vector.load %arg1[%c0, %c0_0] : memref<8x100xf32, #tpu.memory_space<vmem>>, vector<8x100xf32>
    %1 = arith.truncf %0 : vector<8x100xf32> to vector<8x100xbf16>
    %c0_1 = arith.constant 0 : index
    %c0_2 = arith.constant 0 : index
    %2 = vector.load %arg2[%c0_1, %c0_2] : memref<100x200xbf16, #tpu.memory_space<vmem>>, vector<100x200xbf16>
    %cst = arith.constant dense<0.000000e+00> : vector<8x200xf32>
    %3 = tpu.matmul %1, %2, %cst {dimension_numbers = #tpu.dot_dimension_numbers<[1], [0], [0], [1], [0, 0, 1, 1], [], []>} : vector<8x100xbf16>, vector<100x200xbf16>, vector<8x200xf32> -> vector<8x200xf32>
    %c0_3 = arith.constant 0 : index
    %c0_4 = arith.constant 0 : index
    %4 = vector.load %arg3[%c0_3, %c0_4] : memref<1x200xf32, #tpu.memory_space<vmem>>, vector<1x200xf32>
    %5 = vector.broadcast %4 : vector<1x200xf32> to vector<8x200xf32>
    %6 = arith.addf %3, %5 : vector<8x200xf32>
    %cst_5 = arith.constant 0.000000e+00 : f32
    %7 = vector.broadcast %cst_5 : f32 to vector<8x200xf32>
    %8 = arith.cmpf oge, %6, %7 : vector<8x200xf32>
    %cst_6 = arith.constant 2.000000e-02 : f32
    %9 = vector.broadcast %cst_6 : f32 to vector<8x200xf32>
    %10 = arith.mulf %9, %6 : vector<8x200xf32>
    %11 = arith.select %8, %6, %10 : vector<8x200xi1>, vector<8x200xf32>
    %cst_7 = arith.constant dense<0.000000e+00> : vector<8xf32>
    %12 = vector.multi_reduction <add>, %11, %cst_7 [1] : vector<8x200xf32> to vector<8xf32>
    %13 = vector.shape_cast %12 : vector<8xf32> to vector<8x1xf32>
    %cst_8 = arith.constant 2.000000e+02 : f32
    %14 = vector.broadcast %cst_8 : f32 to vector<8x1xf32>
    %15 = arith.divf %13, %14 : vector<8x1xf32>
    %16 = vector.broadcast %15 : vector<8x1xf32> to vector<8x200xf32>
    %17 = arith.subf %11, %16 : vector<8x200xf32>
    %18 = arith.mulf %17, %17 : vector<8x200xf32>
    %cst_9 = arith.constant dense<0.000000e+00> : vector<8xf32>
    %19 = vector.multi_reduction <add>, %18, %cst_9 [1] : vector<8x200xf32> to vector<8xf32>
    %20 = vector.shape_cast %19 : vector<8xf32> to vector<8x1xf32>
    %cst_10 = arith.constant 2.000000e+02 : f32
    %21 = vector.broadcast %cst_10 : f32 to vector<8x1xf32>
    %22 = arith.divf %20, %21 : vector<8x1xf32>
    %cst_11 = arith.constant 9.99999974E-6 : f32
    %23 = vector.broadcast %cst_11 : f32 to vector<8x1xf32>
    %24 = arith.addf %22, %23 : vector<8x1xf32>
    %25 = math.rsqrt %24 : vector<8x1xf32>
    %26 = vector.broadcast %25 : vector<8x1xf32> to vector<8x200xf32>
    %27 = arith.mulf %17, %26 : vector<8x200xf32>
    %c0_12 = arith.constant 0 : index
    %c0_13 = arith.constant 0 : index
    %28 = vector.load %arg4[%c0_12, %c0_13] : memref<1x200xf32, #tpu.memory_space<vmem>>, vector<1x200xf32>
    %29 = vector.broadcast %28 : vector<1x200xf32> to vector<8x200xf32>
    %30 = arith.mulf %27, %29 : vector<8x200xf32>
    %c0_14 = arith.constant 0 : index
    %c0_15 = arith.constant 0 : index
    %31 = vector.load %arg5[%c0_14, %c0_15] : memref<1x200xf32, #tpu.memory_space<vmem>>, vector<1x200xf32>
    %32 = vector.broadcast %31 : vector<1x200xf32> to vector<8x200xf32>
    %33 = arith.addf %30, %32 : vector<8x200xf32>
    %34 = arith.truncf %33 : vector<8x200xf32> to vector<8x200xbf16>
    %c0_16 = arith.constant 0 : index
    %c0_17 = arith.constant 0 : index
    %35 = vector.load %arg6[%c0_16, %c0_17] : memref<200x784xbf16, #tpu.memory_space<vmem>>, vector<200x784xbf16>
    %cst_18 = arith.constant dense<0.000000e+00> : vector<8x784xf32>
    %36 = tpu.matmul %34, %35, %cst_18 {dimension_numbers = #tpu.dot_dimension_numbers<[1], [0], [0], [1], [0, 0, 1, 1], [], []>} : vector<8x200xbf16>, vector<200x784xbf16>, vector<8x784xf32> -> vector<8x784xf32>
    %c0_19 = arith.constant 0 : index
    %c0_20 = arith.constant 0 : index
    %37 = vector.load %arg7[%c0_19, %c0_20] : memref<1x784xf32, #tpu.memory_space<vmem>>, vector<1x784xf32>
    %38 = vector.broadcast %37 : vector<1x784xf32> to vector<8x784xf32>
    %39 = arith.addf %36, %38 : vector<8x784xf32>
    %cst_21 = arith.constant 0.000000e+00 : f32
    %40 = vector.broadcast %cst_21 : f32 to vector<8x784xf32>
    %41 = arith.subf %40, %39 : vector<8x784xf32>
    %42 = math.exp %41 : vector<8x784xf32>
    %cst_22 = arith.constant 1.000000e+00 : f32
    %43 = vector.broadcast %cst_22 : f32 to vector<8x784xf32>
    %44 = arith.addf %43, %42 : vector<8x784xf32>
    %45 = tpu.reciprocal %44 {approx = true} : vector<8x784xf32> -> vector<8x784xf32>
    %46 = arith.truncf %45 : vector<8x784xf32> to vector<8x784xbf16>
    %c0_23 = arith.constant 0 : index
    %c0_24 = arith.constant 0 : index
    %47 = vector.load %arg8[%c0_23, %c0_24] : memref<8x784xbf16, #tpu.memory_space<vmem>>, vector<8x784xbf16>
    tpu.vector_store %arg8[%c0_23, %c0_24], %46 {strides = array<i32>} : memref<8x784xbf16, #tpu.memory_space<vmem>>, vector<8x784xbf16>,
    return
  }
  func.func @transform_0(%arg0: i32) -> (i32, i32) {
    %c0_i32 = arith.constant 0 : i32
    %c0_i32_0 = arith.constant 0 : i32
    return %arg0, %c0_i32 : i32, i32
  }
  func.func @transform_1(%arg0: i32) -> (i32, i32) {
    %c0_i32 = arith.constant 0 : i32
    %c0_i32_0 = arith.constant 0 : i32
    %c0_i32_1 = arith.constant 0 : i32
    return %c0_i32, %c0_i32_0 : i32, i32
  }
  func.func @transform_2(%arg0: i32) -> (i32, i32) {
    %c0_i32 = arith.constant 0 : i32
    %c0_i32_0 = arith.constant 0 : i32
    %c0_i32_1 = arith.constant 0 : i32
    return %c0_i32, %c0_i32_0 : i32, i32
  }
  func.func @transform_3(%arg0: i32) -> (i32, i32) {
    %c0_i32 = arith.constant 0 : i32
    %c0_i32_0 = arith.constant 0 : i32
    %c0_i32_1 = arith.constant 0 : i32
    return %c0_i32, %c0_i32_0 : i32, i32
  }
  func.func @transform_4(%arg0: i32) -> (i32, i32) {
    %c0_i32 = arith.constant 0 : i32
    %c0_i32_0 = arith.constant 0 : i32
    %c0_i32_1 = arith.constant 0 : i32
    return %c0_i32, %c0_i32_0 : i32, i32
  }
  func.func @transform_5(%arg0: i32) -> (i32, i32) {
    %c0_i32 = arith.constant 0 : i32
    %c0_i32_0 = arith.constant 0 : i32
    %c0_i32_1 = arith.constant 0 : i32
    return %c0_i32, %c0_i32_0 : i32, i32
  }
  func.func @transform_6(%arg0: i32) -> (i32, i32) {
    %c0_i32 = arith.constant 0 : i32
    %c0_i32_0 = arith.constant 0 : i32
    %c0_i32_1 = arith.constant 0 : i32
    return %c0_i32, %c0_i32_0 : i32, i32
  }
  func.func @transform_7(%arg0: i32) -> (i32, i32) {
    %c0_i32 = arith.constant 0 : i32
    %c0_i32_0 = arith.constant 0 : i32
    return %arg0, %c0_i32 : i32, i32
  }
}

</mosaic_0001>

<bundles_post_ra>
// kernel: generator_forward.1
= control target key start
LH: loop header
LB: loop body
LE: loop exit
PB: predicated region body
PF: predicated region fallthrough
CT: control target
= control target key end

     0   :  { %12 = vsyncpa [#allocation3], 0  ;;  %s1622_s0 = inlined_call_operand.vmem [shape: f32[8,100], index: 0, kind: input, shape index: {}]   ;;  %s1623_s1 = inlined_call_operand.vmem [shape: bf16[100,200], index: 1, kind: input, shape index: {}]   ;;  %s1624_s2 = inlined_call_operand.vmem [shape: f32[1,200], index: 2, kind: input, shape index: {}]   ;;  %s1625_s3 = inlined_call_operand.vmem [shape: f32[1,200], index: 3, kind: input, shape index: {}]   ;;  %s1626_s4 = inlined_call_operand.vmem [shape: f32[1,200], index: 4, kind: input, shape index: {}]   ;;  %s1627_s5 = inlined_call_operand.hbm [shape: bf16[200,784], index: 5, kind: input, shape index: {}]   ;;  %s1628_s6 = inlined_call_operand.vmem [shape: f32[1,784], index: 6, kind: input, shape index: {}]   ;;  %s1629_s7 = inlined_call_operand.hbm [shape: bf16[8,784], index: 7, kind: output, shape index: {}]  }
   0x1   :  { %13 = vsyncpa [#allocation4], 0  ;;  %s1449_s24 = smov [#allocation2]  }
   0x2   :  { %s29_s25 = sshll.u32 %s1449_s24, 4  ;;  %s30_s25 = int_to_ptr.vmem [resolvable:$true] %s29_s25 }
   0x3   :  { %s1413_s26 = scalar_lea.vmem %s30_s25, 11200  ;;  %p1418_p1 = scmp.lt.s32.totalorder %s30_s25, %s30_s25 }
   0x4   :  { %p1414_p0 = scmp.ne.s32.totalorder %s30_s25, %s1413_s26  ;;  %p1419_p2 = scmp.lt.s32.totalorder %s1413_s26, %s1413_s26 }
   0x6   :  { %p1420_p3 = por %p1419_p2, %p1418_p1 }
   0x8   :  { %p1421_p4 = pnand %p1420_p3, %p1414_p0 }
   0xa   :  { %1424 = shalt.err (!%p1421_p4)
}
   0xb   :  { %s1450_s27 = smov 448   ;;  %s1451_s28 = smov 28  }
   0xc   :  { %35 = dma.hbm_to_vmem [thread:$0]  %s1627_s5, 11200, %s30_s25, [#allocation3], %s1450_s27, %s1450_s27, %s1451_s28  }
   0xd   :  { %1445 = dma.done.wait [#allocation3], 11200  }
   0xe   :  { %1446 = vsyncadd [#allocation3], 4294956096  ;;  %v1452_v0 = vmov 0   ;;  %v56_v1 = vld [vmem:[%s1623_s1 + $0x60] sm:$0x33]  ;;  %vm138_vm0 = vcmask 1041408   ;;  %v59_v19 = vlaneseq }
   0xf   :  { %177 = vmatprep.mubr.bf16.mxu0 %v1452_v0  ;;  %v1114_v2 = vcombine.high %v56_v1, %v56_v1  ;;  %v1113_v3 = vcombine.low %v56_v1, %v56_v1  ;;  %v1230_v4 = vld [vmem:[%s1623_s1 + $0x54] ss:$8 sps:$4 sm:$0xff]   ;;  %v1232_v6 = vld [vmem:[%s1623_s1 + $0x50] ss:$8 sps:$4 sm:$0xff]   ;;  %v1233_v7 = vld [vmem:[%s1623_s1 + $0x44] ss:$8 sps:$4 sm:$0xff]  }
  0x10   :  { %v1235_v8 = vld [vmem:[%s1623_s1 + $0x40] ss:$8 sps:$4 sm:$0xff]   ;;  %v1236_v9 = vld [vmem:[%s1623_s1 + $0x34] ss:$8 sps:$4 sm:$0xff]   ;;  %v1238_v10 = vld [vmem:[%s1623_s1 + $0x30] ss:$8 sps:$4 sm:$0xff]  }
  0x11   :  { %1115 = vmatprep.subr.msk.bf16.mxu0 %vm138_vm0, %v1114_v2  ;;  %v140_v5 = vsel %vm138_vm0, %v1113_v3, 0  ;;  %v1239_v11 = vld [vmem:[%s1623_s1 + $0x24] ss:$8 sps:$4 sm:$0xff]   ;;  %v1241_v12 = vld [vmem:[%s1623_s1 + $0x20] ss:$8 sps:$4 sm:$0xff]   ;;  %vm134_vm1 = vcmask 818176  }
  0x12   :  { %148 = vmatpush1.bf16.msra.mxu0 %v140_v5  ;;  %v1242_v13 = vld [vmem:[%s1623_s1 + $0x14] ss:$8 sps:$4 sm:$0xff]   ;;  %v1244_v14 = vld [vmem:[%s1623_s1 + $0x10] ss:$8 sps:$4 sm:$0xff]   ;;  %v1245_v15 = vld [vmem:[%s1623_s1 + $0x4] ss:$8 sps:$4 sm:$0xff]  }
  0x13   :  { %149 = vmatprep.subr.bf16.mxu0 %v1230_v4  ;;  %v1247_v16 = vld [vmem:[%s1623_s1] ss:$8 sps:$4 sm:$0xff]   ;;  %v1540_v20 = vshrl.u32 %v59_v19, 7  ;;  %vm192_vm4 = vcmask 588800   ;;  %v1250_v39 = vld [vmem:[#allocation2 + $0x190] ss:$28 sps:$4 sm:$0xff]  }
  0x14   :  { %v42_v17 = vld [vmem:[%s1622_s0] sm:$0xff]  ;;  %v1248_v38 = vld [vmem:[#allocation2 + $0x18c] ss:$28 sps:$4 sm:$0xff]   ;;  %v1252_v40 = vld [vmem:[#allocation2 + $0x194] ss:$28 sps:$4 sm:$0xff]   ;;  %vm832_vm5 = vcmask 1043456  }
  0x15   :  { %v43_v18 = vpack.c.bf16 %v42_v17, %v42_v17  ;;  %v1543_v21 = vsub.s32 0, %v1540_v20  ;;  %v57_v22 = vld [vmem:[%s1624_s2] sm:$0x3]  ;;  %v1549_v23 = vsub.s32 1, %v1540_v20  ;;  %v1253_v41 = vld [vmem:[#allocation2 + $0x188] ss:$28 sps:$4 sm:$0xff]   ;;  %854 = vmatprep.subr.bf16.mxu1 %v1248_v38 }
  0x16   :  { %150 = vmatpush1.bf16.msra.mxu0 %v1232_v6  ;;  %v1254_v42 = vld [vmem:[#allocation2 + $0x154] ss:$28 sps:$4 sm:$0xff]   ;;  %v1258_v43 = vld [vmem:[#allocation2 + $0x15c] ss:$28 sps:$4 sm:$0xff]   ;;  %855 = vmatpush1.bf16.msra.mxu1 %v1253_v41  ;;  %v1264_v47 = vld [vmem:[#allocation2 + $0x124] ss:$28 sps:$4 sm:$0xff]  }
  0x17   :  { %151 = vmatprep.subr.bf16.mxu0 %v1233_v7  ;;  %v62_v24 = vrot.slane %v57_v22, %v1543_v21  ;;  %v66_v25 = vrot.slane %v57_v22, %v1549_v23  ;;  %v1256_v44 = vld [vmem:[#allocation2 + $0x158] ss:$28 sps:$4 sm:$0xff]   ;;  %v1259_v45 = vld [vmem:[#allocation2 + $0x150] ss:$28 sps:$4 sm:$0xff]   ;;  %856 = vmatprep.subr.bf16.mxu1 %v1254_v42  ;;  %v1262_v48 = vld [vmem:[#allocation2 + $0x120] ss:$28 sps:$4 sm:$0xff]  }
  0x18   :  { %v1260_v46 = vld [vmem:[#allocation2 + $0x11c] ss:$28 sps:$4 sm:$0xff]   ;;  %v1266_v50 = vld [vmem:[#allocation2 + $0xe4] ss:$28 sps:$4 sm:$0xff]   ;;  %v1270_v51 = vld [vmem:[#allocation2 + $0xec] ss:$28 sps:$4 sm:$0xff]  }
  0x19   :  { %v1265_v49 = vld [vmem:[#allocation2 + $0x118] ss:$28 sps:$4 sm:$0xff]   ;;  %v1268_v52 = vld [vmem:[#allocation2 + $0xe8] ss:$28 sps:$4 sm:$0xff]   ;;  %v1271_v53 = vld [vmem:[#allocation2 + $0xe0] ss:$28 sps:$4 sm:$0xff]  }
  0x1a   :  { %152 = vmatpush1.bf16.msra.mxu0 %v1235_v8  ;;  %857 = vmatpush1.bf16.msra.mxu1 %v1259_v45  ;;  %v1272_v54 = vld [vmem:[#allocation2 + $0xac] ss:$28 sps:$4 sm:$0xff]   ;;  %v1276_v55 = vld [vmem:[#allocation2 + $0xb4] ss:$28 sps:$4 sm:$0xff]   ;;  %v1282_v59 = vld [vmem:[#allocation2 + $0x7c] ss:$28 sps:$4 sm:$0xff]  }
  0x1b   :  { %153 = vmatprep.subr.bf16.mxu0 %v1236_v9  ;;  %858 = vmatprep.subr.bf16.mxu1 %v1260_v46  ;;  %v1274_v56 = vld [vmem:[#allocation2 + $0xb0] ss:$28 sps:$4 sm:$0xff]   ;;  %v1277_v57 = vld [vmem:[#allocation2 + $0xa8] ss:$28 sps:$4 sm:$0xff]   ;;  %v1280_v60 = vld [vmem:[#allocation2 + $0x78] ss:$28 sps:$4 sm:$0xff]  }
  0x1c   :  { %v1278_v58 = vld [vmem:[#allocation2 + $0x74] ss:$28 sps:$4 sm:$0xff]   ;;  %v1284_v62 = vld [vmem:[#allocation2 + $0x3c] ss:$28 sps:$4 sm:$0xff]   ;;  %v1288_v63 = vld [vmem:[#allocation2 + $0x44] ss:$28 sps:$4 sm:$0xff]  }
  0x1d   :  { %v1283_v61 = vld [vmem:[#allocation2 + $0x70] ss:$28 sps:$4 sm:$0xff]   ;;  %v1286_v1 = vld [vmem:[#allocation2 + $0x40] ss:$28 sps:$4 sm:$0xff]   ;;  %v1289_v2 = vld [vmem:[#allocation2 + $0x38] ss:$28 sps:$4 sm:$0xff]  }
  0x1e   :  { %154 = vmatpush1.bf16.msra.mxu0 %v1238_v10  ;;  %859 = vmatpush1.bf16.msra.mxu1 %v1265_v49  ;;  %v1300_v22 = vld [vmem:[#allocation2 + $0x26c] ss:$28 sps:$4 sm:$0xff]   ;;  %v1318_v38 = vld [vmem:[#allocation2 + $0x1c4] ss:$28 sps:$4 sm:$0xff]   ;;  %v1326_v42 = vld [vmem:[#allocation2 + $0x19c] ss:$28 sps:$4 sm:$0xff]  }
  0x1f   :  { %155 = vmatprep.subr.bf16.mxu0 %v1239_v11  ;;  %860 = vmatprep.subr.bf16.mxu1 %v1266_v50  ;;  %v1290_v11 = vld [vmem:[#allocation2 + $0x4] ss:$28 sps:$4 sm:$0xff]   ;;  %vm1084_vm6 = vcmask 125952  }
  0x20   :  { %v1320_v41 = vld [vmem:[#allocation2 + $0x1c8] ss:$28 sps:$4 sm:$0xff]   ;;  %v212_v46 = vld [vmem:[%s1625_s3] sm:$0x3] }
  0x21   :  { %v217_v49 = vrot.slane %v212_v46, %v1543_v21 }
  0x22   :  { %156 = vmatpush1.bf16.msra.mxu0 %v1241_v12  ;;  %861 = vmatpush1.bf16.msra.mxu1 %v1271_v53  ;;  %v1294_v12 = vld [vmem:[#allocation2 + $0xc] ss:$28 sps:$4 sm:$0xff]  }
  0x23   :  { %157 = vmatprep.subr.bf16.mxu0 %v1242_v13  ;;  %862 = vmatprep.subr.bf16.mxu1 %v1272_v54  ;;  %v1292_v13 = vld [vmem:[#allocation2 + $0x8] ss:$28 sps:$4 sm:$0xff]  }
  0x26   :  { %158 = vmatpush1.bf16.msra.mxu0 %v1244_v14  ;;  %863 = vmatpush1.bf16.msra.mxu1 %v1277_v57  ;;  %v1295_v14 = vld [vmem:[#allocation2] ss:$28 sps:$4 sm:$0xff]  }
  0x27   :  { %159 = vmatprep.subr.bf16.mxu0 %v1245_v15  ;;  %864 = vmatprep.subr.bf16.mxu1 %v1278_v58  ;;  %v338_v15 = vld [vmem:[#allocation2 + $0x2a0] sm:$0xff] }
  0x28   :  { %v1202_v17 = vcombine.high %v338_v15, %v338_v15  ;;  %v1201_v19 = vcombine.low %v338_v15, %v338_v15  ;;  %v1350_v15 = vld [vmem:[#allocation2 + $0x4c] ss:$28 sps:$4 sm:$0xff]  }
  0x2a   :  { %160 = vmatpush1.bf16.msra.mxu0 %v1247_v16  ;;  %865 = vmatpush1.bf16.msra.mxu1 %v1283_v61  ;;  %v339_v16 = vld [vmem:[#allocation2 + $0x2a8] sm:$0xff] }
  0x2b   :  { %895 = vmatprep.subr.bf16.mxu0 %v1252_v40  ;;  %866 = vmatprep.subr.bf16.mxu1 %v1284_v62  ;;  %v1323_v40 = vld [vmem:[#allocation2 + $0x1c0] ss:$28 sps:$4 sm:$0xff]  }
  0x2c   :  { %v1327_v62 = vld [vmem:[#allocation2 + $0x1a0] ss:$28 sps:$4 sm:$0xff]  }
  0x2d   :  { %1116 = vmatmul.mubr.msk.bf16.vlgmr.msra.gmra.mxu0 %vm134_vm1, %v43_v18  ;;  %v1204_v18 = vcombine.high %v339_v16, %v339_v16 }
  0x2e   :  { %896 = vmatpush1.bf16.msra.mxu0 %v1250_v39  ;;  %867 = vmatpush1.bf16.msra.mxu1 %v1289_v2  ;;  %v1322_v39 = vld [vmem:[#allocation2 + $0x1cc] ss:$28 sps:$4 sm:$0xff]  }
  0x2f   :  { %897 = vmatprep.subr.bf16.mxu0 %v1258_v43  ;;  %868 = vmatprep.subr.bf16.mxu1 %v1290_v11  ;;  %v1331_v2 = vld [vmem:[#allocation2 + $0x168] ss:$28 sps:$4 sm:$0xff]   ;;  %v1343_v11 = vld [vmem:[#allocation2 + $0xc0] ss:$28 sps:$4 sm:$0xff]  }
  0x32   :  { %898 = vmatpush1.bf16.msra.mxu0 %v1256_v44  ;;  %869 = vmatpush1.bf16.msra.mxu1 %v1295_v14  ;;  %v1347_v14 = vld [vmem:[#allocation2 + $0x88] ss:$28 sps:$4 sm:$0xff]  }
  0x33   :  { %899 = vmatprep.subr.bf16.mxu0 %v1264_v47  ;;  %1208 = vmatprep.subr.msk.bf16.mxu1 %vm832_vm5, %v1202_v17  ;;  %v226_v47 = vld [vmem:[%s1626_s4] sm:$0x3]  ;;  %v1351_v17 = vld [vmem:[#allocation2 + $0x50] ss:$28 sps:$4 sm:$0xff]  }
  0x34   :  { %v231_v54 = vrot.slane %v226_v47, %v1543_v21 }
  0x36   :  { %900 = vmatpush1.bf16.msra.mxu0 %v1262_v48  ;;  %v221_v48 = vrot.slane %v212_v46, %v1549_v23 }
  0x37   :  { %901 = vmatprep.subr.bf16.mxu0 %v1270_v51 }
  0x3a   :  { %902 = vmatpush1.bf16.msra.mxu0 %v1268_v52  ;;  %v235_v52 = vrot.slane %v226_v47, %v1549_v23 }
  0x3b   :  { %903 = vmatprep.subr.bf16.mxu0 %v1276_v55 }
  0x3e   :  { %904 = vmatpush1.bf16.msra.mxu0 %v1274_v56 }
  0x3f   :  { %905 = vmatprep.subr.bf16.mxu0 %v1282_v59 }
  0x42   :  { %906 = vmatpush1.bf16.msra.mxu0 %v1280_v60  ;;  %v1324_v60 = vld [vmem:[#allocation2 + $0x198] ss:$28 sps:$4 sm:$0xff]  }
  0x43   :  { %907 = vmatprep.subr.bf16.mxu0 %v1288_v63  ;;  %v1330_v63 = vld [vmem:[#allocation2 + $0x164] ss:$28 sps:$4 sm:$0xff]  }
  0x46   :  { %908 = vmatpush1.bf16.msra.mxu0 %v1286_v1  ;;  %v1328_v1 = vld [vmem:[#allocation2 + $0x160] ss:$28 sps:$4 sm:$0xff]  }
  0x47   :  { %909 = vmatprep.subr.bf16.mxu0 %v1294_v12  ;;  %v1346_v12 = vld [vmem:[#allocation2 + $0x84] ss:$28 sps:$4 sm:$0xff]  }
  0x4a   :  { %910 = vmatpush1.bf16.msra.mxu0 %v1292_v13  ;;  %v1344_v13 = vld [vmem:[#allocation2 + $0x80] ss:$28 sps:$4 sm:$0xff]  }
  0x4b   :  { %1210 = vmatprep.subr.msk.bf16.mxu0 %vm832_vm5, %v1204_v18  ;;  %v1354_v18 = vld [vmem:[#allocation2 + $0x14] ss:$28 sps:$4 sm:$0xff]  }
  0xed   :  { %v179_v26 = vpop.f32.mrf.mxu0 }
  0xee   :  { %v180_v27 = vadd.f32 %v179_v26, %v62_v24  ;;  %v1203_v24 = vcombine.low %v339_v16, %v339_v16  ;;  %v834_v26 = vsel %vm832_vm5, %v1201_v19, 0  ;;  %v1348_v16 = vld [vmem:[#allocation2 + $0x48] ss:$28 sps:$4 sm:$0xff]   ;;  %v340_v19 = vld [vmem:[#allocation2 + $0x2b0] sm:$0xff] }
  0xef   :  { %v181_v28 = vpop.f32.mrf.mxu0  ;;  %877 = vmatpush2.bf16.msra.mxu1 %v834_v26  ;;  %v1205_v26 = vcombine.low %v340_v19, %v340_v19 }
  0xf0   :  { %v182_v29 = vadd.f32 %v181_v28, %v66_v25  ;;  %v188_v30 = vmul.f32 0.02, %v180_v27  ;;  %vm186_vm2 = vcmp.ge.f32.partialorder %v180_v27, 0.0  ;;  %v1304_v25 = vld [vmem:[#allocation2 + $0x274] ss:$28 sps:$4 sm:$0xff]   ;;  %878 = vmatprep.subr.bf16.mxu1 %v1300_v22 }
  0xf1   :  { %v183_v31 = vpop.f32.mrf.mxu0  ;;  %v1305_v28 = vld [vmem:[#allocation2 + $0x268] ss:$28 sps:$4 sm:$0xff]   ;;  %v1352_v22 = vld [vmem:[#allocation2 + $0x10] ss:$28 sps:$4 sm:$0xff]  }
  0xf2   :  { %v189_v32 = vmul.f32 0.02, %v182_v29  ;;  %vm187_vm3 = vcmp.ge.f32.partialorder %v182_v29, 0.0  ;;  %v190_v35 = vsel %vm186_vm2, %v180_v27, %v188_v30  ;;  %v840_v27 = vsel %vm832_vm5, %v1203_v24, 0  ;;  %v1306_v30 = vld [vmem:[#allocation2 + $0x234] ss:$28 sps:$4 sm:$0xff]  }
  0xf3   :  { %v184_v33 = vpop.f32.mrf.mxu0  ;;  %918 = vmatpush2.bf16.msra.mxu0 %v840_v27  ;;  %v1310_v31 = vld [vmem:[#allocation2 + $0x23c] ss:$28 sps:$4 sm:$0xff]   ;;  %879 = vmatpush2.bf16.msra.mxu1 %v1305_v28  ;;  %v846_v28 = vsel %vm832_vm5, %v1205_v26, 0 }
  0xf4   :  { %v1553_v34 = vsel %vm187_vm3, %v182_v29, %v189_v32  ;;  %v1302_v29 = vld [vmem:[#allocation2 + $0x270] ss:$28 sps:$4 sm:$0xff]   ;;  %919 = vmatprep.subr.bf16.mxu0 %v1304_v25  ;;  %880 = vmatprep.subr.bf16.mxu1 %v1306_v30  ;;  %v1308_v33 = vld [vmem:[#allocation2 + $0x238] ss:$28 sps:$4 sm:$0xff]   ;;  %v1206_v25 = vcombine.high %v340_v19, %v340_v19  ;;  %v366_v19 = vsub.s32 5, %v1540_v20 }
  0xf5   :  { %v193_v36 = vsel %vm192_vm4, %v1553_v34, 0.0  ;;  %v1311_v32 = vld [vmem:[#allocation2 + $0x230] ss:$28 sps:$4 sm:$0xff]   ;;  %v1355_v24 = vld [vmem:[#allocation2 + $0x18] ss:$28 sps:$4 sm:$0xff]  }
  0xf6   :  { %v194_v37 = vadd.f32 %v193_v36, %v190_v35  ;;  %v1317_v36 = vld [vmem:[#allocation2 + $0x1f8] ss:$28 sps:$4 sm:$0xff]  }
  0xf7   :  { %920 = vmatpush2.bf16.msra.mxu0 %v1302_v29  ;;  %881 = vmatpush2.bf16.msra.mxu1 %v1311_v32  ;;  %v1358_v27 = vld [vmem:[#allocation2 + $0x2b8] ss:$0 sps:$4 sm:$0xff]   ;;  %v1362_v32 = vld [vmem:[#allocation2 + $0x280] ss:$28 sps:$4 sm:$0xff]  }
  0xf8   :  { %195 = vadd.xlane.f32.xlu0 %v194_v37  ;;  %921 = vmatprep.subr.bf16.mxu0 %v1310_v31  ;;  %v1314_v37 = vld [vmem:[#allocation2 + $0x200] ss:$28 sps:$4 sm:$0xff]   ;;  %v852_v29 = vsel %vm832_vm5, %v1358_v27, 0  ;;  %v1359_v31 = vld [vmem:[#allocation2 + $0x278] ss:$28 sps:$4 sm:$0xff]  }
  0xf9   :  { %v1361_v30 = vld [vmem:[#allocation2 + $0x27c] ss:$28 sps:$4 sm:$0xff]  }
  0xfb   :  { %922 = vmatpush2.bf16.msra.mxu0 %v1308_v33  ;;  %v1365_v33 = vld [vmem:[#allocation2 + $0x244] ss:$28 sps:$4 sm:$0xff]  }
 0x181   :  { %v196_v3 = vpop.xlane.xlu0 %195 }
 0x182   :  { %v198_v4 = vmul.f32 0.005, %v196_v3  ;;  %v1334_v3 = vld [vmem:[#allocation2 + $0x12c] ss:$28 sps:$4 sm:$0xff]  }
 0x184   :  { %v1557_v5 = vsub.f32 %v190_v35, %v198_v4  ;;  %v1560_v6 = vsub.f32 %v1553_v34, %v198_v4  ;;  %v1312_v34 = vld [vmem:[#allocation2 + $0x1fc] ss:$28 sps:$4 sm:$0xff]   ;;  %v1316_v35 = vld [vmem:[#allocation2 + $0x204] ss:$28 sps:$4 sm:$0xff]  }
 0x185   :  { %882 = vmatprep.subr.bf16.mxu1 %v1312_v34  ;;  %923 = vmatprep.subr.bf16.mxu0 %v1316_v35  ;;  %v1332_v4 = vld [vmem:[#allocation2 + $0x128] ss:$28 sps:$4 sm:$0xff]   ;;  %v1363_v34 = vld [vmem:[#allocation2 + $0x240] ss:$28 sps:$4 sm:$0xff]  }
 0x186   :  { %v201_v7 = vmul.f32 %v1557_v5, %v1557_v5  ;;  %v202_v8 = vmul.f32 %v1560_v6, %v1560_v6  ;;  %883 = vmatpush2.bf16.msra.mxu1 %v1317_v36  ;;  %924 = vmatpush2.bf16.msra.mxu0 %v1314_v37  ;;  %v1366_v35 = vld [vmem:[#allocation2 + $0x248] ss:$28 sps:$4 sm:$0xff]  }
 0x187   :  { %884 = vmatprep.subr.bf16.mxu1 %v1318_v38  ;;  %925 = vmatprep.subr.bf16.mxu0 %v1322_v39  ;;  %v1369_v36 = vld [vmem:[#allocation2 + $0x20c] ss:$28 sps:$4 sm:$0xff]   ;;  %v1373_v39 = vld [vmem:[#allocation2 + $0x1d4] ss:$28 sps:$4 sm:$0xff]  }
 0x188   :  { %v203_v9 = vsel %vm192_vm4, %v202_v8, 0.0  ;;  %v1339_v8 = vld [vmem:[#allocation2 + $0xf8] ss:$28 sps:$4 sm:$0xff]   ;;  %v1367_v37 = vld [vmem:[#allocation2 + $0x208] ss:$28 sps:$4 sm:$0xff]  }
 0x189   :  { %v204_v10 = vadd.f32 %v203_v9, %v201_v7  ;;  %v1336_v7 = vld [vmem:[#allocation2 + $0xf0] ss:$28 sps:$4 sm:$0xff]   ;;  %v1342_v9 = vld [vmem:[#allocation2 + $0xbc] ss:$28 sps:$4 sm:$0xff]  }
 0x18a   :  { %885 = vmatpush2.bf16.msra.mxu1 %v1323_v40  ;;  %926 = vmatpush2.bf16.msra.mxu0 %v1320_v41  ;;  %v1370_v38 = vld [vmem:[#allocation2 + $0x210] ss:$28 sps:$4 sm:$0xff]   ;;  %v1374_v41 = vld [vmem:[#allocation2 + $0x1d8] ss:$28 sps:$4 sm:$0xff]  }
 0x18b   :  { %205 = vadd.xlane.f32.xlu0 %v204_v10  ;;  %977 = vmatprep.subr.bf16.mxu0 %v1452_v0  ;;  %v1340_v10 = vld [vmem:[#allocation2 + $0xb8] ss:$28 sps:$4 sm:$0xff]   ;;  %v1371_v40 = vld [vmem:[#allocation2 + $0x1d0] ss:$28 sps:$4 sm:$0xff]  }
 0x18c   :  { %936 = vmatprep.subr.bf16.mxu1 %v1326_v42  ;;  %v354_v42 = vsub.s32 2, %v1540_v20 }
 0x214   :  { %v206_v43 = vpop.xlane.xlu0 %205 }
 0x215   :  { %v207_v44 = vmul.f32 0.005, %v206_v43  ;;  %v342_v43 = vld [vmem:[%s1628_s6] sm:$0x7f]  ;;  %s1453_s6 = smov [#allocation5]  }
 0x216   :  { %v355_v46 = vrot.slane %v342_v43, %v354_v42  ;;  %v351_v47 = vrot.slane %v342_v43, %v1549_v23  ;;  %s1092_s14 = sshll.u32 %s1453_s6, 4  ;;  %s1093_s14 = int_to_ptr.vmem [resolvable:$true] %s1092_s14 }
 0x217   :  { %v208_v45 = vadd.f32 1e-05, %v207_v44  ;;  %v358_v44 = vsub.s32 3, %v1540_v20  ;;  %s1425_s15 = scalar_lea.vmem %s1093_s14, 448  ;;  %p1430_p6 = scmp.lt.s32.totalorder %s1093_s14, %s1093_s14 }
 0x218   :  { %p1426_p5 = scmp.ne.s32.totalorder %s1093_s14, %s1425_s15  ;;  %p1431_p7 = scmp.lt.s32.totalorder %s1425_s15, %s1425_s15 }
 0x219   :  { %1375 = vrsqrt.f32 %v208_v45  ;;  %v347_v45 = vrot.slane %v342_v43, %v1543_v21 }
 0x21a   :  { %p1432_p8 = por %p1431_p7, %p1430_p6 }
 0x21c   :  { %p1433_p9 = pnand %p1432_p8, %p1426_p5 }
 0x226   :  { %v1376_v50 = vpop.eup %1375 }
 0x227   :  { %v211_v51 = vmul.f32 %v1376_v50, %v1560_v6  ;;  %v210_v53 = vmul.f32 %v1376_v50, %v1557_v5  ;;  %v1335_v5 = vld [vmem:[#allocation2 + $0x130] ss:$28 sps:$4 sm:$0xff]  }
 0x228   :  { %v1338_v6 = vld [vmem:[#allocation2 + $0xf4] ss:$28 sps:$4 sm:$0xff]  }
 0x229   :  { %v225_v55 = vmul.f32 %v221_v48, %v211_v51  ;;  %v224_v56 = vmul.f32 %v217_v49, %v210_v53 }
 0x22b   :  { %v239_v57 = vadd.f32 %v235_v52, %v225_v55  ;;  %v238_v58 = vadd.f32 %v231_v54, %v224_v56 }
 0x22d   :  { %v241_v59 = vpack.c.bf16 %v239_v57, %v239_v57  ;;  %v1584_v61 = vpack.c.bf16 %v238_v58, %v238_v58 }
 0x22f   :  { %1209 = vmatprep.mubr.msk.bf16.mxu1 %vm192_vm4, %v241_v59  ;;  %1211 = vmatprep.mubr.msk.bf16.mxu0 %vm192_vm4, %v241_v59 }
 0x230   :  { %887 = vmatmul.mubr.bf16.vlgmr.msra.gmra.mxu1 %v1584_v61  ;;  %928 = vmatmul.mubr.bf16.vlgmr.msra.gmra.mxu0 %v1584_v61 }
 0x231   :  { %937 = vmatpush1.bf16.msra.mxu1 %v1324_v60  ;;  %978 = vmatpush1.bf16.msra.mxu0 %v1327_v62 }
 0x232   :  { %1213 = vmatprep.mubr.msk.bf16.mxu1 %vm192_vm4, %v241_v59  ;;  %1214 = vmatprep.mubr.msk.bf16.mxu0 %vm192_vm4, %v241_v59 }
 0x233   :  { %938 = vmatprep.subr.bf16.mxu1 %v1330_v63  ;;  %979 = vmatprep.subr.bf16.mxu0 %v1452_v0 }
 0x235   :  { %939 = vmatpush1.bf16.msra.mxu1 %v1328_v1  ;;  %980 = vmatpush1.bf16.msra.mxu0 %v1331_v2 }
 0x236   :  { %940 = vmatprep.subr.bf16.mxu1 %v1334_v3  ;;  %981 = vmatprep.subr.bf16.mxu0 %v1452_v0 }
 0x239   :  { %941 = vmatpush1.bf16.msra.mxu1 %v1332_v4  ;;  %982 = vmatpush1.bf16.msra.mxu0 %v1335_v5 }
 0x23a   :  { %942 = vmatprep.subr.bf16.mxu1 %v1338_v6  ;;  %983 = vmatprep.subr.bf16.mxu0 %v1452_v0 }
 0x23d   :  { %943 = vmatpush1.bf16.msra.mxu1 %v1336_v7  ;;  %984 = vmatpush1.bf16.msra.mxu0 %v1339_v8 }
 0x23e   :  { %944 = vmatprep.subr.bf16.mxu1 %v1342_v9  ;;  %985 = vmatprep.subr.bf16.mxu0 %v1452_v0 }
 0x241   :  { %945 = vmatpush1.bf16.msra.mxu1 %v1340_v10  ;;  %986 = vmatpush1.bf16.msra.mxu0 %v1343_v11 }
 0x242   :  { %946 = vmatprep.subr.bf16.mxu1 %v1346_v12  ;;  %987 = vmatprep.subr.bf16.mxu0 %v1452_v0 }
 0x245   :  { %947 = vmatpush1.bf16.msra.mxu1 %v1344_v13  ;;  %988 = vmatpush1.bf16.msra.mxu0 %v1347_v14 }
 0x246   :  { %948 = vmatprep.subr.bf16.mxu1 %v1350_v15  ;;  %989 = vmatprep.subr.bf16.mxu0 %v1452_v0 }
 0x249   :  { %949 = vmatpush1.bf16.msra.mxu1 %v1348_v16  ;;  %990 = vmatpush1.bf16.msra.mxu0 %v1351_v17  ;;  %v362_v17 = vsub.s32 4, %v1540_v20 }
 0x24a   :  { %950 = vmatprep.subr.bf16.mxu1 %v1354_v18  ;;  %991 = vmatprep.subr.bf16.mxu0 %v1452_v0  ;;  %v370_v18 = vsub.s32 6, %v1540_v20 }
 0x24d   :  { %951 = vmatpush1.bf16.msra.mxu1 %v1352_v22  ;;  %992 = vmatpush1.bf16.msra.mxu0 %v1355_v24  ;;  %v363_v22 = vrot.slane %v342_v43, %v362_v17  ;;  %v371_v24 = vrot.slane %v342_v43, %v370_v18 }
 0x24e   :  { %1212 = vmatprep.subr.msk.bf16.mxu1 %vm832_vm5, %v1206_v25  ;;  %999 = vmatprep.subr.bf16.mxu0 %v1452_v0  ;;  %v367_v25 = vrot.slane %v342_v43, %v366_v19 }
 0x251   :  { %959 = vmatpush2.bf16.msra.mxu1 %v846_v28  ;;  %1000 = vmatpush2.bf16.msra.mxu0 %v852_v29 }
 0x252   :  { %960 = vmatprep.subr.bf16.mxu1 %v1361_v30  ;;  %1001 = vmatprep.subr.bf16.mxu0 %v1452_v0 }
 0x255   :  { %961 = vmatpush2.bf16.msra.mxu1 %v1359_v31  ;;  %1002 = vmatpush2.bf16.msra.mxu0 %v1362_v32 }
 0x256   :  { %962 = vmatprep.subr.bf16.mxu1 %v1365_v33  ;;  %1003 = vmatprep.subr.bf16.mxu0 %v1452_v0 }
 0x259   :  { %963 = vmatpush2.bf16.msra.mxu1 %v1363_v34  ;;  %1004 = vmatpush2.bf16.msra.mxu0 %v1366_v35 }
 0x25a   :  { %964 = vmatprep.subr.bf16.mxu1 %v1369_v36  ;;  %1005 = vmatprep.subr.bf16.mxu0 %v1452_v0 }
 0x25d   :  { %965 = vmatpush2.bf16.msra.mxu1 %v1367_v37  ;;  %1006 = vmatpush2.bf16.msra.mxu0 %v1370_v38 }
 0x25e   :  { %966 = vmatprep.subr.bf16.mxu1 %v1373_v39  ;;  %1007 = vmatprep.subr.bf16.mxu0 %v1452_v0  ;;  %v359_v0 = vrot.slane %v342_v43, %v358_v44 }
 0x261   :  { %967 = vmatpush2.bf16.msra.mxu1 %v1371_v40  ;;  %1008 = vmatpush2.bf16.msra.mxu0 %v1374_v41 }
 0x264   :  { %969 = vmatmul.mubr.bf16.vlgmr.msra.gmra.mxu1 %v1584_v61  ;;  %1010 = vmatmul.mubr.bf16.vlgmr.msra.gmra.mxu0 %v1584_v61 }
 0x2f0   :  { %v888_v48 = vpop.f32.mrf.mxu1  ;;  %v929_v49 = vpop.f32.mrf.mxu0 }
 0x2f1   :  { %v889_v50 = vadd.f32 %v888_v48, %v347_v45  ;;  %v930_v51 = vadd.f32 %v929_v49, %v355_v46 }
 0x2f2   :  { %v890_v52 = vpop.f32.mrf.mxu1  ;;  %v931_v53 = vpop.f32.mrf.mxu0 }
 0x2f3   :  { %v1017_v54 = vsub.f32 0.0, %v889_v50  ;;  %v1019_v55 = vsub.f32 0.0, %v930_v51  ;;  %v891_v56 = vadd.f32 %v890_v52, %v351_v47  ;;  %v932_v57 = vadd.f32 %v931_v53, %v359_v0 }
 0x2f4   :  { %v892_v58 = vpop.f32.mrf.mxu1  ;;  %v933_v59 = vpop.f32.mrf.mxu0 }
 0x2f5   :  { %v1024_v60 = vmul.f32 1.442695, %v1017_v54  ;;  %v1028_v61 = vmul.f32 1.442695, %v1019_v55  ;;  %v1018_v62 = vsub.f32 0.0, %v891_v56  ;;  %v1020_v21 = vsub.f32 0.0, %v932_v57 }
 0x2f6   :  { %v893_v63 = vpop.f32.mrf.mxu1  ;;  %v934_v1 = vpop.f32.mrf.mxu0 }
 0x2f7   :  { %1377 = vpow2.f32 %v1024_v60  ;;  %v1026_v23 = vmul.f32 1.442695, %v1018_v62  ;;  %v1030_v2 = vmul.f32 1.442695, %v1020_v21 }
 0x2f8   :  { %1379 = vpow2.f32 %v1028_v61 }
 0x2f9   :  { %1381 = vpow2.f32 %v1026_v23 }
 0x2fa   :  { %1383 = vpow2.f32 %v1030_v2 }
 0x304   :  { %v1378_v3 = vpop.eup %1377 }
 0x305   :  { %v1380_v4 = vpop.eup %1379  ;;  %v1038_v5 = vadd.f32 1.0, %v1378_v3 }
 0x306   :  { %v1382_v6 = vpop.eup %1381  ;;  %v1040_v7 = vadd.f32 1.0, %v1380_v4 }
 0x307   :  { %v1384_v8 = vpop.eup %1383  ;;  %1385 = vrcp.f32 %v1038_v5  ;;  %v1039_v9 = vadd.f32 1.0, %v1382_v6 }
 0x308   :  { %1387 = vrcp.f32 %v1040_v7  ;;  %v1041_v10 = vadd.f32 1.0, %v1384_v8 }
 0x309   :  { %1389 = vrcp.f32 %v1039_v9 }
 0x30a   :  { %1391 = vrcp.f32 %v1041_v10 }
 0x314   :  { %v1386_v11 = vpop.eup %1385 }
 0x315   :  { %v1388_v12 = vpop.eup %1387 }
 0x316   :  { %v1390_v13 = vpop.eup %1389 }
 0x317   :  { %v1392_v14 = vpop.eup %1391  ;;  %v1219_v15 = vpack.c.bf16 %v1390_v13, %v1386_v11 }
 0x318   :  { %v1220_v16 = vpack.c.bf16 %v1392_v14, %v1388_v12 }
 0x319   :  { %1081 = vst [vmem:[#allocation5] sm:$0xff] %v1219_v15 }
 0x31a   :  { %1082 = vst [vmem:[#allocation5 + $0x8] sm:$0xff] %v1220_v16 }
 0x324   :  { %v970_v26 = vpop.f32.mrf.mxu1  ;;  %v1011_v27 = vpop.f32.mrf.mxu0 }
 0x325   :  { %v971_v28 = vadd.f32 %v970_v26, %v363_v22  ;;  %v1012_v29 = vadd.f32 %v1011_v27, %v371_v24 }
 0x326   :  { %v972_v30 = vpop.f32.mrf.mxu1  ;;  %v1013_v31 = vpop.f32.mrf.mxu0 }
 0x327   :  { %v1021_v32 = vsub.f32 0.0, %v971_v28  ;;  %v1023_v33 = vsub.f32 0.0, %v1012_v29  ;;  %v973_v34 = vadd.f32 %v972_v30, %v367_v25 }
 0x328   :  { %v974_v35 = vpop.f32.mrf.mxu1  ;;  %v1014_v36 = vpop.f32.mrf.mxu0 }
 0x329   :  { %v1032_v37 = vmul.f32 1.442695, %v1021_v32  ;;  %v1036_v38 = vmul.f32 1.442695, %v1023_v33  ;;  %v1022_v39 = vsub.f32 0.0, %v973_v34 }
 0x32a   :  { %v975_v40 = vpop.f32.mrf.mxu1  ;;  %v1015_v41 = vpop.f32.mrf.mxu0 }
 0x32b   :  { %1393 = vpow2.f32 %v1032_v37  ;;  %v1034_v20 = vmul.f32 1.442695, %v1022_v39 }
 0x32c   :  { %1395 = vpow2.f32 %v1036_v38 }
 0x32d   :  { %1397 = vpow2.f32 %v1034_v20 }
 0x338   :  { %v1394_v42 = vpop.eup %1393 }
 0x339   :  { %v1396_v43 = vpop.eup %1395  ;;  %v1042_v44 = vadd.f32 1.0, %v1394_v42 }
 0x33a   :  { %v1398_v45 = vpop.eup %1397  ;;  %v1044_v46 = vadd.f32 1.0, %v1396_v43 }
 0x33b   :  { %1399 = vrcp.f32 %v1042_v44  ;;  %v1043_v47 = vadd.f32 1.0, %v1398_v45 }
 0x33c   :  { %1401 = vrcp.f32 %v1044_v46 }
 0x33d   :  { %1403 = vrcp.f32 %v1043_v47 }
 0x348   :  { %v1400_v0 = vpop.eup %1399 }
 0x349   :  { %v1402_v48 = vpop.eup %1401 }
 0x34a   :  { %v1404_v49 = vpop.eup %1403  ;;  %v1222_v50 = vpack.c.bf16 %v1402_v48, %v1402_v48 }
 0x34b   :  { %v1221_v51 = vpack.c.bf16 %v1404_v49, %v1400_v0 }
 0x34c   :  { %1085 = vst.msk [vmem:[#allocation5 + $0x18] sm:$0xf] %vm1084_vm6, %v1222_v50 }
 0x34d   :  { %1083 = vst [vmem:[#allocation5 + $0x10] sm:$0xff] %v1221_v51 }
 0x34e   :  { %1436 = shalt.err (!%p1433_p9)
}
 0x34f   :  { %1095 = dma.vmem_to_hbm [thread:$0]  %s1093_s14, 448, %s1629_s7, [#allocation4]  }
 0x350   :  { %1447 = dma.done.wait [#allocation4], 448  }
 0x351   :  { %1448 = vsyncadd [#allocation4], 4294966848 }
 0x352   :  { %1099 = vsyncpa [#allocation3], 1 }
 0x353   :  { %1100 = vsyncpa [#allocation4], 1 }

</bundles_post_ra>
